<compile_context>
chip_gen: v7x
topology: tpu7x:2x2x1
jax: 0.10.0
libtpu: 0.0.40
codegen_flags: <defaults>
</compile_context>

<pallas_src>
import functools

import jax
import jax.numpy as jnp
from jax.experimental import pallas as pl
from jax.experimental.pallas import tpu as pltpu


_MIN_BLOCK_BYTES = 1 << 20   # ~1 MiB per-step blocks already reach ~85% of HBM roofline
_TARGET_STEPS = 8            # >= 4 grid steps per TensorCore on v7x


# ---------------------------------------------------------------------------
# Activations (bound statically into the kernels).
# ---------------------------------------------------------------------------
def _hidden_act(v, kind):
    if kind == "relu":                 # nn.ReLU (module default)
        return jnp.maximum(v, 0.0)
    # TODO(synk): other hidden activations (e.g. nn.Hardswish / nn.SiLU) not implemented.
    raise ValueError(f"unsupported activation: {kind!r}")


def _scale_act(v, kind):
    if kind == "sigmoid":              # nn.Sigmoid (module default)
        return jax.nn.sigmoid(v)
    if kind == "hardsigmoid":          # nn.Hardsigmoid == relu6(x + 3) / 6 (MobileNetV3 SE)
        return jnp.minimum(jnp.maximum(v + 3.0, 0.0), 6.0) * (1.0 / 6.0)
    raise ValueError(f"unsupported scale_activation: {kind!r}")


# ---------------------------------------------------------------------------
# Kernels.
# ---------------------------------------------------------------------------
def _se_fused_kernel(x_ref, w1t_ref, b1_ref, w2t_ref, b2_ref, o_ref, *,
                     spatial_axis, hidden, scale):
    """Single-pass SE: pool -> fc1 -> act -> fc2 -> scale_act -> excite."""
    x = x_ref[...]                                              # (Bt, C, HW) or (Bt, HW, C)
    # f32-accumulated global average pool (no explicit full-block astype copy).
    pooled = jnp.mean(x, axis=spatial_axis, dtype=jnp.float32)  # (Bt, C)
    s = jnp.dot(pooled, w1t_ref[...], preferred_element_type=jnp.float32) + b1_ref[...]
    s = _hidden_act(s, hidden)                                  # (Bt, S)
    z = jnp.dot(s, w2t_ref[...], preferred_element_type=jnp.float32) + b2_ref[...]
    sc = _scale_act(z, scale).astype(x.dtype)                   # (Bt, C)
    if spatial_axis == 2:        # NCHW block (Bt, C, HW): broadcast along lanes
        o_ref[...] = x * sc[:, :, None]
    else:                        # NHWC block (Bt, HW, C): broadcast along sublanes
        o_ref[...] = x * sc[:, None, :]


def _se_pool_kernel(x_ref, pooled_ref):
    """Fallback pass 1: per-(batch, channel-tile) global average pool."""
    # x_ref: (1, 1, Ct, HW);  pooled_ref: (1, 1, 1, Ct)
    m = jnp.mean(x_ref[...], axis=-1, dtype=jnp.float32)        # (1, 1, Ct)
    pooled_ref[...] = m[:, :, None, :]


def _se_scale_kernel(pooled_ref, w1t_ref, b1_ref, w2t_ref, b2_ref, x_ref, o_ref, *,
                     hidden, scale):
    """Fallback pass 2: recompute (tiny) fc stack per block and excite."""
    pooled = pooled_ref[...][0]                                  # (1, C) f32
    s = jnp.dot(pooled, w1t_ref[...], preferred_element_type=jnp.float32) + b1_ref[...]
    s = _hidden_act(s, hidden)                                   # (1, S)
    w2blk = w2t_ref[...][0]                                      # (S, Ct)
    b2blk = b2_ref[...][0]                                       # (1, Ct)
    z = jnp.dot(s, w2blk, preferred_element_type=jnp.float32) + b2blk
    sc = _scale_act(z, scale).astype(o_ref.dtype)                # (1, Ct)
    o_ref[...] = x_ref[...] * sc[None, :, :, None]               # (1,1,Ct,HW)*(1,1,Ct,1)


# ---------------------------------------------------------------------------
# Tiling / VMEM heuristics.
# ---------------------------------------------------------------------------
def _vmem_config():
    """(vmem budget for tile picking, vmem_limit_bytes) per chip generation."""
    try:
        phys = int(pltpu.get_tpu_info().vmem_capacity_bytes)
    except Exception:
        phys = 64 << 20            # unknown: assume v7x-class (64 MiB per TC)
    if phys >= (100 << 20):        # v5e / v6e: 128 MiB physical VMEM
        return 48 << 20, 64 << 20
    return 16 << 20, 32 << 20      # v7x (or unknown): stay inside 32 MiB scoped VMEM


def _pick_batch_tile(B, C, HW, itemsize, weight_bytes, budget):
    """Largest batch tile that fits VMEM while keeping a deep, balanced grid.

    Returns None if even a single batch element does not fit (-> fallback path).
    """
    per_elem = C * HW * itemsize

    def vmem_bytes(bt):
        blk = bt * per_elem
        tot = 4 * blk                      # in + out blocks, double-buffered
        if itemsize < 4:
            tot += bt * C * HW * 4         # f32 pool accumulation temp (conservative)
        tot += 2 * weight_bytes            # grid-invariant weights, still double-buffered
        return tot

    cands = [bt for bt in range(1, B + 1) if B % bt == 0 and vmem_bytes(bt) <= budget]
    if not cands:
        return None

    def key(bt):
        steps = B // bt
        blk = bt * per_elem
        return (
            blk >= _MIN_BLOCK_BYTES,            # 1) per-step DMA >= ~1 MiB
            min(steps, _TARGET_STEPS),          # 2) pipeline depth (up to ~8 steps)
            steps % 2 == 0 or steps == 1,       # 3) even step count (v7x dual-TC balance)
            blk,                                # 4) then the biggest block
        )

    return max(cands, key=key)


def _pick_channel_tile(C, HW, S, itemsize, budget):
    """Channel tile for the two-pass fallback; None if nothing fits."""
    best, best_key = None, None
    for ct in range(1, C + 1):
        if C % ct:
            continue
        blk = ct * HW * itemsize
        p1 = 2 * blk + (ct * HW * 4 if itemsize < 4 else 0) + 4 * ct      # pool pass
        p2 = 4 * blk + 2 * 4 * (C + C * S + S + S * ct + ct)              # excite pass
        if max(p1, p2) > budget:
            continue
        k = (ct % 8 == 0, ct)          # prefer sublane-aligned tiles, then biggest
        if best is None or k > best_key:
            best, best_key = ct, k
    return best


# ---------------------------------------------------------------------------
# Public wrapper.
# ---------------------------------------------------------------------------
def squeeze_excitation(x, w1, b1, w2, b2, *,
                       activation="relu", scale_activation="sigmoid",
                       data_format="NCHW", batch_tile=None,
                       vmem_budget_bytes=None, donate_x=False):
    """SqueezeExcitation forward.

    x: (B, C, H, W) for NCHW or (B, H, W, C) for NHWC.
    w1: (S, C); b1: (S,); w2: (C, S); b2: (C,)   (1x1 conv kernels flattened).
    """
    if data_format == "NCHW":
        B, C, H, W = x.shape
    elif data_format == "NHWC":
        B, H, W, C = x.shape
    else:
        raise ValueError(f"unsupported data_format: {data_format!r}")
    S = w1.shape[0]
    assert w1.shape == (S, C) and w2.shape == (C, S) and b1.shape == (S,) and b2.shape == (C,)
    HW = H * W
    itemsize = jnp.dtype(x.dtype).itemsize

    budget, vmem_limit = _vmem_config()
    if vmem_budget_bytes is not None:
        budget = int(vmem_budget_bytes)

    # Host-side layout prep (free): pre-transpose weights, 2-D biases.
    w1t = w1.T                       # (C, S)
    w2t = w2.T                       # (S, C)
    b1r = b1.reshape(1, S)
    b2r = b2.reshape(1, C)
    weight_bytes = 4 * (2 * C * S + C + S)

    if batch_tile is not None:
        bt = int(batch_tile)
        assert B % bt == 0, "batch_tile must divide batch"
    else:
        bt = _pick_batch_tile(B, C, HW, itemsize, weight_bytes, budget)

    # ---------------- fused single-pass path (one HBM read + one write of x) ----
    if bt is not None:
        if data_format == "NCHW":
            x_flat = x.reshape(B, C, HW)
            block = (bt, C, HW)
            spatial_axis = 2
        else:                         # NHWC: channel axis lane-dense (7x7 stages)
            x_flat = x.reshape(B, HW, C)
            block = (bt, HW, C)
            spatial_axis = 1

        cost = pl.CostEstimate(
            flops=int(2 * B * C * HW + 4 * B * C * S),   # pool adds + excite mul + fc MACs
            transcendentals=int(B * C),
            bytes_accessed=int(2 * B * C * HW * itemsize + weight_bytes))

        out_flat = pl.pallas_call(
            functools.partial(_se_fused_kernel, spatial_axis=spatial_axis,
                              hidden=activation, scale=scale_activation),
            out_shape=jax.ShapeDtypeStruct(x_flat.shape, x.dtype),
            grid_spec=pltpu.PrefetchScalarGridSpec(
                num_scalar_prefetch=0,
                grid=(B // bt,),
                in_specs=[
                    pl.BlockSpec(block, lambda i: (i, 0, 0)),
                    pl.BlockSpec((C, S), lambda i: (0, 0)),
                    pl.BlockSpec((1, S), lambda i: (0, 0)),
                    pl.BlockSpec((S, C), lambda i: (0, 0)),
                    pl.BlockSpec((1, C), lambda i: (0, 0)),
                ],
                out_specs=pl.BlockSpec(block, lambda i: (i, 0, 0)),
            ),
            compiler_params=pltpu.CompilerParams(
                dimension_semantics=("parallel",),
                vmem_limit_bytes=vmem_limit),
            input_output_aliases=({0: 0} if donate_x else {}),
            cost_estimate=cost,
        )(x_flat, w1t, b1r, w2t, b2r)
        return out_flat.reshape(x.shape)

    # ---------------- fallback: C-tiled two-pass path (block too big for VMEM) ----
    if data_format != "NCHW":
        # TODO(synk): HW-tiled fallback for NHWC (only needed for very large spatial extents).
        raise NotImplementedError("NHWC fallback tiling not implemented")
    ct = _pick_channel_tile(C, HW, S, itemsize, budget)
    if ct is None:
        # TODO(synk): additionally tile the spatial axis when even one channel
        # tile exceeds the VMEM budget.
        raise NotImplementedError("input too large for the C-tiled fallback")
    n_ct = C // ct

    # All reshapes below are contiguity-preserving (free); weight re-blocking is tiny.
    x4 = x.reshape(B, n_ct, ct, HW)
    w2blk = w2.reshape(n_ct, ct, S).transpose(0, 2, 1)     # (n_ct, S, ct)
    b2blk = b2.reshape(n_ct, 1, ct)

    pooled = pl.pallas_call(
        _se_pool_kernel,
        out_shape=jax.ShapeDtypeStruct((B, n_ct, 1, ct), jnp.float32),
        grid_spec=pltpu.PrefetchScalarGridSpec(
            num_scalar_prefetch=0,
            grid=(B, n_ct),
            in_specs=[pl.BlockSpec((1, 1, ct, HW), lambda b, c: (b, c, 0, 0))],
            out_specs=pl.BlockSpec((1, 1, 1, ct), lambda b, c: (b, c, 0, 0)),
        ),
        compiler_params=pltpu.CompilerParams(
            dimension_semantics=("parallel", "parallel"),
            vmem_limit_bytes=vmem_limit),
        cost_estimate=pl.CostEstimate(
            flops=int(B * C * HW), transcendentals=0,
            bytes_accessed=int(B * C * HW * itemsize + B * C * 4)),
    )(x4)
    pooled = pooled.reshape(B, 1, C)                       # free, contiguous

    out4 = pl.pallas_call(
        functools.partial(_se_scale_kernel, hidden=activation, scale=scale_activation),
        out_shape=jax.ShapeDtypeStruct((B, n_ct, ct, HW), x.dtype),
        grid_spec=pltpu.PrefetchScalarGridSpec(
            num_scalar_prefetch=0,
            grid=(B, n_ct),
            in_specs=[
                pl.BlockSpec((1, 1, C), lambda b, c: (b, 0, 0)),        # pooled (B,1,C)
                pl.BlockSpec((C, S), lambda b, c: (0, 0)),              # w1t
                pl.BlockSpec((1, S), lambda b, c: (0, 0)),              # b1
                pl.BlockSpec((1, S, ct), lambda b, c: (c, 0, 0)),       # w2 block
                pl.BlockSpec((1, 1, ct), lambda b, c: (c, 0, 0)),       # b2 block
                pl.BlockSpec((1, 1, ct, HW), lambda b, c: (b, c, 0, 0)),  # x
            ],
            out_specs=pl.BlockSpec((1, 1, ct, HW), lambda b, c: (b, c, 0, 0)),
        ),
        compiler_params=pltpu.CompilerParams(
            dimension_semantics=("parallel", "parallel"),
            vmem_limit_bytes=vmem_limit),
        input_output_aliases=({5: 0} if donate_x else {}),
        cost_estimate=pl.CostEstimate(
            flops=int(B * C * HW + 4 * B * C * S),
            transcendentals=int(B * C),
            bytes_accessed=int(2 * B * C * HW * itemsize + B * C * 4 + weight_bytes)),
    )(pooled, w1t, b1r, w2blk, b2blk, x4)
    return out4.reshape(x.shape)


# ---------------------------------------------------------------------------
# Pure-JAX reference.
# ---------------------------------------------------------------------------
def _reference(x, w1, b1, w2, b2, *, scale_activation="sigmoid", data_format="NCHW"):
    if data_format == "NHWC":
        x = jnp.transpose(x, (0, 3, 1, 2))
    pooled = jnp.mean(x, axis=(2, 3))                      # (B, C)
    s = jax.nn.relu(pooled @ w1.T + b1)                    # (B, S)
    z = s @ w2.T + b2                                      # (B, C)
    if scale_activation == "sigmoid":
        sc = jax.nn.sigmoid(z)
    elif scale_activation == "hardsigmoid":
        sc = jnp.minimum(jnp.maximum(z + 3.0, 0.0), 6.0) / 6.0
    else:
        raise ValueError(scale_activation)
    out = x * sc[:, :, None, None]
    if data_format == "NHWC":
        out = jnp.transpose(out, (0, 2, 3, 1))
    return out


if __name__ == "__main__":
    key = jax.random.PRNGKey(0)

    # --- test 1: module defaults (ReLU + Sigmoid), fused single-pass path ------
    B, C, H, W, S = 2, 4, 16, 16, 2
    kx, k1, k2, k3, k4 = jax.random.split(key, 5)
    x = jax.random.normal(kx, (B, C, H, W), dtype=jnp.float32)
    w1 = 0.1 * jax.random.normal(k1, (S, C), dtype=jnp.float32)
    b1 = 0.1 * jax.random.normal(k2, (S,), dtype=jnp.float32)
    w2 = 0.1 * jax.random.normal(k3, (C, S), dtype=jnp.float32)
    b2 = 0.1 * jax.random.normal(k4, (C,), dtype=jnp.float32)

    out = jax.block_until_ready(squeeze_excitation(x, w1, b1, w2, b2))
    ref = _reference(x, w1, b1, w2, b2, scale_activation="sigmoid")
    assert out.shape == (B, C, H, W)
    assert jnp.allclose(out, ref, atol=1e-4, rtol=1e-4), "sigmoid path mismatch"

    # --- test 2: Hardsigmoid scale activation (MobileNetV3 SE blocks) ----------
    out_hs = jax.block_until_ready(
        squeeze_excitation(x, w1, b1, w2, b2, scale_activation="hardsigmoid"))
    ref_hs = _reference(x, w1, b1, w2, b2, scale_activation="hardsigmoid")
    assert jnp.allclose(out_hs, ref_hs, atol=1e-4, rtol=1e-4), "hardsigmoid path mismatch"

    # --- test 3: force the C-tiled two-pass fallback (VMEM-constrained path) ---
    B2, C2, S2, H2, W2 = 2, 256, 16, 8, 8
    kx2, k1b, k2b, k3b, k4b = jax.random.split(jax.random.PRNGKey(1), 5)
    x2 = jax.random.normal(kx2, (B2, C2, H2, W2), dtype=jnp.float32)
    w1_2 = 0.1 * jax.random.normal(k1b, (S2, C2), dtype=jnp.float32)
    b1_2 = 0.1 * jax.random.normal(k2b, (S2,), dtype=jnp.float32)
    w2_2 = 0.1 * jax.random.normal(k3b, (C2, S2), dtype=jnp.float32)
    b2_2 = 0.1 * jax.random.normal(k4b, (C2,), dtype=jnp.float32)
    out2 = jax.block_until_ready(
        squeeze_excitation(x2, w1_2, b1_2, w2_2, b2_2, vmem_budget_bytes=256 << 10))
    ref2 = _reference(x2, w1_2, b1_2, w2_2, b2_2, scale_activation="sigmoid")
    assert jnp.allclose(out2, ref2, atol=5e-3, rtol=5e-3), "fallback path mismatch"

    # --- test 4: NHWC (channels-last) layout for a small-spatial 7x7 stage ------
    B3, H3, W3, C3, S3 = 2, 7, 7, 128, 32
    kx3, k1c, k2c, k3c, k4c = jax.random.split(jax.random.PRNGKey(2), 5)
    x3 = jax.random.normal(kx3, (B3, H3, W3, C3), dtype=jnp.float32)
    w1_3 = 0.1 * jax.random.normal(k1c, (S3, C3), dtype=jnp.float32)
    b1_3 = 0.1 * jax.random.normal(k2c, (S3,), dtype=jnp.float32)
    w2_3 = 0.1 * jax.random.normal(k3c, (C3, S3), dtype=jnp.float32)
    b2_3 = 0.1 * jax.random.normal(k4c, (C3,), dtype=jnp.float32)
    out3 = jax.block_until_ready(
        squeeze_excitation(x3, w1_3, b1_3, w2_3, b2_3, data_format="NHWC"))
    ref3 = _reference(x3, w1_3, b1_3, w2_3, b2_3,
                      scale_activation="sigmoid", data_format="NHWC")
    assert jnp.allclose(out3, ref3, atol=5e-3, rtol=5e-3), "NHWC path mismatch"

    print("KERNEL_OK")
</pallas_src>

<mosaic_0001>
module attributes {stable_mosaic.version = 11 : i64} {
  func.func @_se_fused_kernel(%arg0: i32, %arg1: memref<1x4x256xf32, #tpu.memory_space<vmem>>, %arg2: memref<4x2xf32, #tpu.memory_space<vmem>>, %arg3: memref<1x2xf32, #tpu.memory_space<vmem>>, %arg4: memref<2x4xf32, #tpu.memory_space<vmem>>, %arg5: memref<1x4xf32, #tpu.memory_space<vmem>>, %arg6: memref<1x4x256xf32, #tpu.memory_space<vmem>>) attributes {dimension_semantics = [#tpu.dimension_semantics<parallel>], iteration_bounds = array<i64: 2>, scalar_prefetch = 0 : i64, scratch_operands = 0 : i64, tpu.core_type = #tpu.core_type<tc>, window_params = [{transform_indices = @transform_0, window_bounds = array<i64: 1, 4, 256>}, {pipeline_mode = #tpu.pipeline_mode<synchronous>, transform_indices = @transform_1, window_bounds = array<i64: 4, 2>}, {pipeline_mode = #tpu.pipeline_mode<synchronous>, transform_indices = @transform_2, window_bounds = array<i64: 1, 2>}, {pipeline_mode = #tpu.pipeline_mode<synchronous>, transform_indices = @transform_3, window_bounds = array<i64: 2, 4>}, {pipeline_mode = #tpu.pipeline_mode<synchronous>, transform_indices = @transform_4, window_bounds = array<i64: 1, 4>}, {transform_indices = @transform_5, window_bounds = array<i64: 1, 4, 256>}]} {
    %c0 = arith.constant 0 : index
    %c0_0 = arith.constant 0 : index
    %c0_1 = arith.constant 0 : index
    %0 = vector.load %arg1[%c0, %c0_0, %c0_1] : memref<1x4x256xf32, #tpu.memory_space<vmem>>, vector<1x4x256xf32>
    %cst = arith.constant dense<0.000000e+00> : vector<1x4xf32>
    %1 = vector.multi_reduction <add>, %0, %cst [2] : vector<1x4x256xf32> to vector<1x4xf32>
    %cst_2 = arith.constant 2.560000e+02 : f32
    %2 = vector.broadcast %cst_2 : f32 to vector<1x4xf32>
    %3 = arith.divf %1, %2 : vector<1x4xf32>
    %c0_3 = arith.constant 0 : index
    %c0_4 = arith.constant 0 : index
    %4 = vector.load %arg2[%c0_3, %c0_4] : memref<4x2xf32, #tpu.memory_space<vmem>>, vector<4x2xf32>
    %cst_5 = arith.constant dense<0.000000e+00> : vector<1x2xf32>
    %5 = tpu.matmul %3, %4, %cst_5 {dimension_numbers = #tpu.dot_dimension_numbers<[1], [0], [0], [1], [0, 0, 1, 1], [], []>} : vector<1x4xf32>, vector<4x2xf32>, vector<1x2xf32> -> vector<1x2xf32>
    %c0_6 = arith.constant 0 : index
    %c0_7 = arith.constant 0 : index
    %6 = vector.load %arg3[%c0_6, %c0_7] : memref<1x2xf32, #tpu.memory_space<vmem>>, vector<1x2xf32>
    %7 = arith.addf %5, %6 : vector<1x2xf32>
    %cst_8 = arith.constant 0.000000e+00 : f32
    %8 = vector.broadcast %cst_8 : f32 to vector<1x2xf32>
    %9 = arith.maximumf %7, %8 : vector<1x2xf32>
    %c0_9 = arith.constant 0 : index
    %c0_10 = arith.constant 0 : index
    %10 = vector.load %arg4[%c0_9, %c0_10] : memref<2x4xf32, #tpu.memory_space<vmem>>, vector<2x4xf32>
    %cst_11 = arith.constant dense<0.000000e+00> : vector<1x4xf32>
    %11 = tpu.matmul %9, %10, %cst_11 {dimension_numbers = #tpu.dot_dimension_numbers<[1], [0], [0], [1], [0, 0, 1, 1], [], []>} : vector<1x2xf32>, vector<2x4xf32>, vector<1x4xf32> -> vector<1x4xf32>
    %c0_12 = arith.constant 0 : index
    %c0_13 = arith.constant 0 : index
    %12 = vector.load %arg5[%c0_12, %c0_13] : memref<1x4xf32, #tpu.memory_space<vmem>>, vector<1x4xf32>
    %13 = arith.addf %11, %12 : vector<1x4xf32>
    %14 = arith.negf %13 : vector<1x4xf32>
    %15 = math.exp %14 : vector<1x4xf32>
    %cst_14 = arith.constant 1.000000e+00 : f32
    %16 = vector.broadcast %cst_14 : f32 to vector<1x4xf32>
    %17 = arith.addf %16, %15 : vector<1x4xf32>
    %18 = arith.divf %16, %17 : vector<1x4xf32>
    %19 = vector.shape_cast %18 : vector<1x4xf32> to vector<1x4x1xf32>
    %20 = vector.broadcast %19 : vector<1x4x1xf32> to vector<1x4x256xf32>
    %21 = arith.mulf %0, %20 : vector<1x4x256xf32>
    %c0_15 = arith.constant 0 : index
    %c0_16 = arith.constant 0 : index
    %c0_17 = arith.constant 0 : index
    %22 = vector.load %arg6[%c0_15, %c0_16, %c0_17] : memref<1x4x256xf32, #tpu.memory_space<vmem>>, vector<1x4x256xf32>
    tpu.vector_store %arg6[%c0_15, %c0_16, %c0_17], %21 {strides = array<i32>} : memref<1x4x256xf32, #tpu.memory_space<vmem>>, vector<1x4x256xf32>,
    return
  }
  func.func @transform_0(%arg0: i32) -> (i32, i32, i32) {
    %c0_i32 = arith.constant 0 : i32
    %c0_i32_0 = arith.constant 0 : i32
    %c0_i32_1 = arith.constant 0 : i32
    return %arg0, %c0_i32, %c0_i32_0 : i32, i32, i32
  }
  func.func @transform_1(%arg0: i32) -> (i32, i32) {
    %c0_i32 = arith.constant 0 : i32
    %c0_i32_0 = arith.constant 0 : i32
    %c0_i32_1 = arith.constant 0 : i32
    return %c0_i32, %c0_i32_0 : i32, i32
  }
  func.func @transform_2(%arg0: i32) -> (i32, i32) {
    %c0_i32 = arith.constant 0 : i32
    %c0_i32_0 = arith.constant 0 : i32
    %c0_i32_1 = arith.constant 0 : i32
    return %c0_i32, %c0_i32_0 : i32, i32
  }
  func.func @transform_3(%arg0: i32) -> (i32, i32) {
    %c0_i32 = arith.constant 0 : i32
    %c0_i32_0 = arith.constant 0 : i32
    %c0_i32_1 = arith.constant 0 : i32
    return %c0_i32, %c0_i32_0 : i32, i32
  }
  func.func @transform_4(%arg0: i32) -> (i32, i32) {
    %c0_i32 = arith.constant 0 : i32
    %c0_i32_0 = arith.constant 0 : i32
    %c0_i32_1 = arith.constant 0 : i32
    return %c0_i32, %c0_i32_0 : i32, i32
  }
  func.func @transform_5(%arg0: i32) -> (i32, i32, i32) {
    %c0_i32 = arith.constant 0 : i32
    %c0_i32_0 = arith.constant 0 : i32
    %c0_i32_1 = arith.constant 0 : i32
    return %arg0, %c0_i32, %c0_i32_0 : i32, i32, i32
  }
}

</mosaic_0001>

<bundles_post_ra>
// kernel: tpu_custom_call.1
= control target key start
LH: loop header
LB: loop body
LE: loop exit
PB: predicated region body
PF: predicated region fallthrough
CT: control target
= control target key end

     0   :  { %10 = vsyncpa [#allocation3], 0  ;;  %s927_s0 = inlined_call_operand.hbm [shape: f32[2,4,256], index: 0, kind: input, shape index: {}]   ;;  %s928_s1 = inlined_call_operand.vmem [shape: f32[4,2], index: 1, kind: input, shape index: {}]   ;;  %s929_s2 = inlined_call_operand.vmem [shape: f32[1,2], index: 2, kind: input, shape index: {}]   ;;  %s930_s3 = inlined_call_operand.vmem [shape: f32[2,4], index: 3, kind: input, shape index: {}]   ;;  %s931_s4 = inlined_call_operand.vmem [shape: f32[1,4], index: 4, kind: input, shape index: {}]   ;;  %s932_s5 = inlined_call_operand.hbm [shape: f32[2,4,256], index: 5, kind: output, shape index: {}]  }
   0x1   :  { %12 = vsyncpa [#allocation3 + $0x1], 0 }
   0x2   :  { %13 = vsyncpa [#allocation4], 0 }
   0x3   :  { %15 = vsyncpa [#allocation4 + $0x1], 0  ;;  %s750_s18 = smov 0   ;;  %s752_s19 = smov 0  }
   0x4   :  { %s754_s20 = smov 0   ;;  %s756_s21 = smov 0  }
   0x5 LB: > { %s771_s22 = sadd.s32 4294967295, %s713_s21   ;;  %s528_s23 = sadd.s32 4294967294, %s713_s21   ;;  %s713_s21 = sphi %s756_s21, %s947_s21   ;;  %s709_s20 = sphi %s754_s20, %s946_s20   ;;  %s705_s19 = sphi %s752_s19, %s945_s19   ;;  %s701_s18 = sphi %s750_s18, %s944_s18  }
   0x6   : > { %s775_s24 = sadd.s32 1, %s713_s21   ;;  %s28_s25 = sadd.s32 1, %s709_s20 }
   0x7   : > { %s25_s26 = ssub.s32 %s713_s21, %s775_s24  ;;  %p35_p0 = scmp.ne.s32.totalorder %s709_s20, %s705_s19 }
   0x8   : > { %p26_p1 = scmp.eq.s32.totalorder %s25_s26, 0  ;;  %p36_p2 = scmp.eq.s32.totalorder %s713_s21, 0 }
   0x9   : > { %p41_p3 = scmp.ne.s32.totalorder %s705_s19, %s701_s18  ;;  %p42_p4 = scmp.eq.s32.totalorder %s771_s22, 0 }
   0xa   : > { %s787_s27 = scalar_select %p26_p1, %s709_s20, %s28_s25  }
   0xb   : > { %p789_p5 = por %p36_p2, %p35_p0  ;;  %p793_p6 = por %p42_p4, %p41_p3 }
   0xc   : > { %p149_p7 = scmp.eq.s32.totalorder %s771_s22, 1  ;;  %p155_p8 = scmp.eq.s32.totalorder %s528_s23, 1 }
   0xd   : > { %p575_p10 = scmp.lt.s32.totalorder %s713_s21, 2  ;;  %s187_s7 = sand.u32 1, %s709_s20  }
   0xe   : > { %p800_p11 = por %p149_p7, %p35_p0  ;;  %p804_p12 = por %p155_p8, %p41_p3 }
   0xf   : > { %s547_s8 = sshll.u32 %s713_s21, 7  ;;  %s531_s9 = sshll.u32 %s187_s7, 3 }
  0x10   : > { %s936_s30 = scalar_select %p800_p11, 1, 0 }
  0x11   : > { %s937_s6 = scalar_select %p804_p12, 1, 0 }
  0x12   : > { %s813_s12 = scalar_lea.hbm %s927_s0, %s547_s8  ;;  %s191_s13 = scalar_lea.vmem [#allocation2], %s531_s9 }
  0x13   : > { %s199_s14 = sshll.u32 %s191_s13, 4  ;;  %p817_p13 = pnand %p575_p10, %p789_p5  ;;  %s821_s14 = int_to_ptr.vmem [resolvable:$true] %s199_s14 }
  0x14   : > { %s188_s16 = scalar_lea.sflag [#allocation3], %s187_s7  ;;  %s617_s17 = scalar_lea.hbm %s813_s12, 128 }
  0x15   : > { %p618_p2 = scmp.ne.s32.totalorder %s813_s12, %s617_s17  ;;  %p619_p3 = pneg %p817_p13 }
  0x16   : > { %s622_s26 = scalar_lea.hbm %s927_s0, 256  ;;  %p623_p5 = scmp.lt.u32.totalorder %s813_s12, %s927_s0 }
  0x17   : > { %p620_p4 = pnand %p619_p3, %p618_p2  ;;  %p624_p8 = scmp.lt.u32.totalorder %s622_s26, %s617_s17 }
  0x18   : > { %p626_p9 = scmp.lt.u32.totalorder %s617_s17, %s813_s12 }
  0x19   : > { %p621_p7 = pneg %p620_p4  ;;  %p625_p10 = por %p624_p8, %p623_p5 }
  0x1b   : > { %p627_p0 = por %p626_p9, %p625_p10 }
  0x1d   : > { %p628_p1 = pnand %p627_p0, %p621_p7 }
  0x1f   : > { %631 = shalt.err (!%p628_p1)
}
  0x20   : > { %s632_s7 = scalar_lea.vmem %s821_s14, 128  ;;  %s715_s9 = smov [#allocation2]  }
  0x21   : > { %p633_p2 = scmp.ne.s32.totalorder %s821_s14, %s632_s7  ;;  %s637_s10 = sshll.u32 %s715_s9, 4  ;;  %s638_s10 = int_to_ptr.vmem [resolvable:$false] %s637_s10 }
  0x22   : > { %s639_s11 = scalar_lea.vmem %s638_s10, 256  ;;  %p640_p11 = scmp.lt.s32.totalorder %s821_s14, %s638_s10 }
  0x23   : > { %p635_p4 = pnand %p633_p2, %p619_p3  ;;  %p641_p5 = scmp.lt.s32.totalorder %s639_s11, %s632_s7 }
  0x25   : > { %p636_p12 = pneg %p635_p4  ;;  %p642_p8 = por %p641_p5, %p640_p11 }
  0x27   : > { %p643_p9 = pnand %p642_p8, %p636_p12 }
  0x29   : > { %646 = shalt.err (!%p643_p9)
}
  0x2a   : > { %570 = dma.hbm_to_vmem [thread:$0]  (!%p817_p13), %s813_s12, 128, %s821_s14, %s188_s16  }
  0x2b   : > { %p939_p0 = scmp.lt.s32.totalorder %s713_s21, 3  ;;  %p940_p1 = scmp.ge.s32.totalorder %s713_s21, 1 }
  0x2d   : > { %p205_p3 = pnand %p940_p1, %p939_p0 }
  0x2e   : > { %s855_s13 = sand.u32 (!%p205_p3), 1, %s705_s19  }
  0x2f   : > { %208 = sbr.rel (%p205_p3) target bundleno = 798 (0x31e), region = 40  ;;  %s535_s17 = sshll.u32 (!%p205_p3), %s855_s13, 3 }
  0x30   : > { %s211_s23 = scalar_lea.sflag (!%p205_p3), [#allocation3], %s855_s13  ;;  %s214_s15 = scalar_lea.vmem (!%p205_p3), [#allocation2], %s535_s17 }
  0x36   : > { %692 = dma.done.wait (%p793_p6), %s211_s23, 128  }
  0x37   : > { %694 = vsyncadd (%p793_p6), %s211_s23, 4294967168  ;;  %vm245_vm0 = vcmask 1043456   ;;  %v241_v0 = vld [vmem:[%s214_s15] sm:$0xff]  ;;  %v716_v5 = vmov 0.0   ;;  %vm717_vm1 = vmmov 0   ;;  %v256_v7 = vlaneseq  ;;  %s548_s7 = sshll.u32 %s771_s22, 7 }
  0x38   : > { %v243_v1 = vcombine.high %v241_v0, %v241_v0  ;;  %v246_v2 = vsel %vm245_vm0, %v241_v0, 0.0  ;;  %553 = vmatprep.subr.mxu0 %v716_v5  ;;  %v253_v6 = vld [vmem:[%s928_s1] sm:$0xf]  ;;  %558 = vmatprep.subr.mxu1 %v716_v5  ;;  %vm262_vm2 = vcmask 31744   ;;  %vm345_vm3 = vcmask 1041408   ;;  %s240_s9 = scalar_lea.vmem [#allocation5], %s535_s17  ;;  %s883_s15 = scalar_lea.hbm %s932_s5, %s548_s7 }
  0x39   : > { %554 = vmatpush3.msk.msra.mxu0 %vm245_vm0, %v253_v6  ;;  %555 = vmatprep.mubr.msk.f32.mxu0 %vm717_vm1, %v716_v5  ;;  %v257_v8 = vand.u32 127, %v256_v7  ;;  %v259_v9 = vshrl.u32 %v256_v7, 7  ;;  %v339_v14 = vld [vmem:[%s930_s3] sm:$0x3]  ;;  %vm341_vm4 = vcmask 15360   ;;  %s458_s10 = sshll.u32 %s240_s9, 4  ;;  %s885_s10 = int_to_ptr.vmem [resolvable:$true] %s458_s10 }
  0x3a   : > { %v247_v3 = vsel %vm245_vm0, %v243_v1, 0.0  ;;  %560 = vmatprep.mubr.msk.f32.mxu1 %vm717_vm1, %v716_v5  ;;  %559 = vmatpush3.msk.msra.mxu1 %vm345_vm3, %v339_v14  ;;  %v254_v15 = vld [vmem:[%s929_s2] sm:$0x1]  ;;  %v718_v30 = vmov 839922192   ;;  %s444_s12 = scalar_lea.sflag [#allocation4], %s855_s13 }
  0x3b   : > { %v248_v4 = vadd.f32 %v247_v3, %v246_v2  ;;  %v260_v10 = vsub.s32 %v257_v8, %v259_v9  ;;  %v340_v20 = vld [vmem:[%s931_s4] sm:$0x1]  ;;  %v427_v27 = vsub.s32 0, %v259_v9  ;;  %v434_v31 = vunpack.c.l.s4 %v718_v30  ;;  %s647_s14 = scalar_lea.vmem %s885_s10, 128  ;;  %p941_p11 = scmp.ne.s32.totalorder %s936_s30, 0 }
  0x3c   : > { %p648_p6 = scmp.ne.s32.totalorder %s885_s10, %s647_s14  ;;  %s719_s22 = smov [#allocation5]  }
  0x3d   : > { %249 = vadd.xlane.f32.xlu0 %v248_v4  ;;  %v435_v32 = vunpack.c.0.s8 %v434_v31  ;;  %s651_s17 = sshll.u32 %s719_s22, 4  ;;  %s652_s17 = int_to_ptr.vmem [resolvable:$false] %s651_s17 }
  0x3e   : > { %p649_p12 = pnand %p648_p6, %p941_p11  ;;  %s653_s29 = scalar_lea.vmem %s652_s17, 256 }
  0x3f   : > { %v438_v33 = vsub.s32 %v435_v32, %v259_v9  ;;  %p654_p7 = scmp.lt.s32.totalorder %s885_s10, %s652_s17  ;;  %p655_p10 = scmp.lt.s32.totalorder %s653_s29, %s647_s14 }
  0x40   : > { %p650_p13 = pneg %p649_p12 }
  0x41   : > { %p656_p2 = por %p655_p10, %p654_p7 }
  0x43   : > { %p657_p4 = pnand %p656_p2, %p650_p13 }
  0xca   : > { %v250_v11 = vpop.xlane.xlu0 %249 }
  0xcb   : > { %v252_v12 = vmul.f32 0.00390625, %v250_v11 }
  0xcd   : > { %v261_v13 = vrot.slane %v252_v12, %v260_v10 }
  0xcf   : > { %556 = vmatmul.mubr.msk.f32.vlgmr.msra.gmra.mrb[0].mxu0 %vm262_vm2, %v261_v13 }
 0x1a2   : > { %v334_v16 = vpop.f32.mrb[0].mxu0 }
 0x1a3   : > { %v335_v17 = vadd.f32 %v334_v16, %v254_v15  ;;  %v557_v18 = vpop.f32.mrb[1].mxu0 }
 0x1a5   : > { %v338_v19 = vmax.f32 %v335_v17, 0.0 }
 0x1a7   : > { %561 = vmatmul.mubr.msk.f32.vlgmr.msra.gmra.mrb[0].mxu1 %vm341_vm4, %v338_v19 }
 0x27a   : > { %v415_v21 = vpop.f32.mrb[0].mxu1 }
 0x27b   : > { %v416_v22 = vadd.f32 %v415_v21, %v340_v20  ;;  %v562_v23 = vpop.f32.mrb[1].mxu1 }
 0x27d   : > { %v541_v24 = vmul.f32 -1.442695, %v416_v22 }
 0x27f   : > { %613 = vpow2.f32 %v541_v24 }
 0x289   : > { %v614_v25 = vpop.eup %613 }
 0x28a   : > { %v422_v26 = vadd.f32 1.0, %v614_v25 }
 0x28c   : > { %615 = vrcp.f32 %v422_v26 }
 0x296   : > { %v616_v28 = vpop.eup %615 }
 0x297   : > { %v428_v29 = vrot.slane %v616_v28, %v427_v27 }
 0x299   : > { %430 = vbcast.lane.b32.xlu0 %v428_v29, 256 }
 0x30b   : > { %v431_v34 = vpop.permute.xlu0 %430 }
 0x30c   : > { %v439_v35 = vrot.slane %v431_v34, %v438_v33 }
 0x30e   : > { %v441_v36 = vmul.f32 %v439_v35, %v241_v0 }
 0x310   : > { %442 = vst [vmem:[%s240_s9] sm:$0xff] %v441_v36 }
 0x311   : > { %660 = shalt.err (!%p657_p4)
}
 0x312   : > { %s661_s13 = scalar_lea.hbm %s883_s15, 128  ;;  %s665_s26 = scalar_lea.hbm %s932_s5, 256 }
 0x313   : > { %p662_p5 = scmp.ne.s32.totalorder %s883_s15, %s661_s13  ;;  %p666_p0 = scmp.lt.u32.totalorder %s883_s15, %s932_s5 }
 0x314   : > { %p667_p1 = scmp.lt.u32.totalorder %s665_s26, %s661_s13  ;;  %p669_p6 = scmp.lt.u32.totalorder %s661_s13, %s883_s15 }
 0x315   : > { %p663_p8 = pnand %p662_p5, %p941_p11 }
 0x316   : > { %p668_p3 = por %p667_p1, %p666_p0 }
 0x317   : > { %p664_p9 = pneg %p663_p8 }
 0x318   : > { %p670_p12 = por %p669_p6, %p668_p3 }
 0x31a   : > { %p671_p13 = pnand %p670_p12, %p664_p9 }
 0x31c   : > { %674 = shalt.err (!%p671_p13)
}
 0x31d   : > { %565 = dma.vmem_to_hbm [thread:$0]  (%p941_p11), %s885_s10, 128, %s883_s15, %s444_s12  }
 0x31e PF: > { %s470_s7 = sand.u32 1, %s701_s18   ;;  %p942_p7 = scmp.ne.s32.totalorder %s937_s6, 0 }
 0x31f   : > { %p943_p10 = scmp.ge.s32.totalorder %s713_s21, 2  ;;  %s471_s9 = scalar_lea.sflag [#allocation4], %s470_s7 }
 0x321   : > { %p572_p2 = pnand %p943_p10, %p942_p7 }
 0x323   : > { %696 = dma.done.wait (!%p572_p2), %s471_s9, 128  }
 0x324   : > { %698 = vsyncadd (!%p572_p2), %s471_s9, 4294967168  ;;  %p18_p4 = scmp.ge.s32.totalorder %s775_s24, 4   ;;  %s944_s18 = smov %s705_s19 }
 0x325   : > { %s945_s19 = smov %s709_s20  ;;  %s946_s20 = smov %s787_s27 }
 0x326   : > { %s947_s21 = smov %s775_s24  ;;  %20 = sbr.rel (!%p18_p4) target bundleno = 5 (0x5), region = 85 }
 0x32d   :  { %476 = vsyncpa [#allocation3], 1 }
 0x32e   :  { %478 = vsyncpa [#allocation3 + $0x1], 1 }
 0x32f   :  { %479 = vsyncpa [#allocation4], 1 }
 0x330   :  { %481 = vsyncpa [#allocation4 + $0x1], 1 }

</bundles_post_ra>
